<compile_context>
chip_gen: v6e
topology: v6e:2x2x1
jax: 0.10.0
libtpu: 0.0.40
codegen_flags: <defaults>
</compile_context>

<pallas_src>
import functools

import jax
import jax.numpy as jnp
from jax import lax
from jax.experimental import pallas as pl
from jax.experimental.pallas import tpu as pltpu


def _round_up(x, m):
    return ((x + m - 1) // m) * m


def _batch_hard_kernel(emb_c_ref, emb_a_ref, sq_c_ref, sq_a_ref,
                       lab_c_ref, lab_a_ref, out_ref, hp_ref, hn_ref, *, margin):
    j = pl.program_id(1)

    @pl.when(j == 0)
    def _init():
        # Hardest-positive half-distance is always >= 0 (self-distance is 0 and
        # self is same-label by construction), so 0 is a safe max identity.
        hp_ref[...] = jnp.zeros(hp_ref.shape, jnp.float32)
        hn_ref[...] = jnp.full(hn_ref.shape, jnp.inf, jnp.float32)

    # (t_c, t_a) Gram tile on the MXU: contract dim 1 of both operands ('NT',
    # no explicit transpose), native input dtype, f32 accumulation.
    gram = lax.dot_general(
        emb_c_ref[...], emb_a_ref[...],
        dimension_numbers=(((1,), (1,)), ((), ())),
        preferred_element_type=jnp.float32)                        # (t_c, t_a)

    # Half squared distances (monotone in the true distance).
    h = jnp.maximum(sq_c_ref[...] + sq_a_ref[...] - gram, 0.0)

    # Padding was folded into the operands by the wrapper: sentinel labels keep
    # padded candidates out of `same`, huge half-norms keep them out of the min.
    same = lab_c_ref[...] == lab_a_ref[...]                        # (t_c, t_a)
    pos = jnp.where(same, h, 0.0)
    neg = jnp.where(same, jnp.inf, h)

    # Running lane-dense carries (candidates are on the sublane axis).
    hp_ref[...] = jnp.maximum(hp_ref[...], jnp.max(pos, axis=0, keepdims=True))
    hn_ref[...] = jnp.minimum(hn_ref[...], jnp.min(neg, axis=0, keepdims=True))

    @pl.when(j == pl.num_programs(1) - 1)
    def _finalize():
        d_pos = jnp.sqrt(2.0 * hp_ref[...])
        d_neg = jnp.sqrt(2.0 * hn_ref[...])       # +inf if no negatives -> loss 0
        out_ref[...] = jnp.maximum(d_pos - d_neg + margin, 0.0)


def _select_tiling(n, d, itemsize, vmem_budget):
    """Returns (t_anchor, t_candidate, n_pad)."""
    def usage(t_a, t_c, resident):
        cand = (1 if resident else 2) * t_c * d * itemsize   # candidate blocks
        anch = 2 * t_a * d * itemsize                        # anchor blocks (dbl buf)
        inter = 6 * t_a * t_c * 4                            # gram/h/pos/neg f32 temps
        return cand + anch + inter

    if n <= 128:
        row_candidates = [max(8, _round_up(n, 8))]
    elif n <= 512:
        row_candidates = [128]          # >=2 row blocks -> both v7x TensorCores busy
    else:
        row_candidates = [256, 128]     # 256 fills the v6e/v7x 256x256 MXU

    # Prefer keeping every candidate embedding resident in VMEM (single column
    # block): candidate HBM traffic drops from grid_rows*N*D to one N*D pass.
    for t_a in row_candidates:
        n_pad = _round_up(n, t_a)
        if usage(t_a, n_pad, True) <= vmem_budget:
            return t_a, n_pad, n_pad

    # Streamed fallback: square tiles, shrink until they fit the budget.
    for t in (256, 128):
        if usage(t, t, False) <= vmem_budget:
            return t, t, _round_up(n, t)
    return 128, 128, _round_up(n, 128)


def batch_hard_triplet_loss(embeddings, labels, margin=1.0, vmem_budget=24 << 20):
    """embeddings: (N, D) float; labels: (N,) int. Returns scalar f32 loss.

    vmem_budget (bytes) gates the candidate-resident fast path; the default
    24 MiB stays under the 32 MiB default scoped VMEM and v7x's 64 MiB cap.
    """
    n, d = embeddings.shape
    itemsize = jnp.dtype(embeddings.dtype).itemsize
    t_a, t_c, n_pad = _select_tiling(n, d, itemsize, int(vmem_budget))
    pad = n_pad - n

    labels = labels.astype(jnp.int32)
    sentinel = jnp.max(labels) + 1          # distinct from every real label

    emb_p = embeddings
    lab_p = labels
    if pad:
        emb_p = jnp.concatenate(
            [emb_p, jnp.zeros((pad, d), embeddings.dtype)], axis=0)
        lab_p = jnp.concatenate(
            [lab_p, jnp.full((pad,), 1, jnp.int32) * sentinel], axis=0)

    # Half squared norms in f32 (exact even for bf16 embeddings), both layouts.
    sq_half = 0.5 * jnp.sum(emb_p.astype(jnp.float32) ** 2, axis=1)   # (n_pad,)
    valid = jnp.arange(n_pad) < n
    sq_cand = jnp.where(valid, sq_half, jnp.float32(1e30)).reshape(n_pad, 1)
    sq_anch = sq_half.reshape(1, n_pad)
    lab_cand = lab_p.reshape(n_pad, 1)
    lab_anch = lab_p.reshape(1, n_pad)

    grid = (n_pad // t_a, n_pad // t_c)
    cand_passes = 1 if t_c == n_pad else grid[0]
    cost = pl.CostEstimate(
        flops=2 * n_pad * n_pad * d,
        transcendentals=2 * n_pad,
        bytes_accessed=int(n_pad * d * itemsize * (1 + cand_passes) + 24 * n_pad),
    )

    kernel = functools.partial(_batch_hard_kernel, margin=float(margin))
    per_anchor = pl.pallas_call(
        kernel,
        out_shape=jax.ShapeDtypeStruct((1, n_pad), jnp.float32),
        grid_spec=pltpu.PrefetchScalarGridSpec(
            num_scalar_prefetch=0,
            grid=grid,
            in_specs=[
                pl.BlockSpec((t_c, d), lambda i, j: (j, 0)),   # candidate rows
                pl.BlockSpec((t_a, d), lambda i, j: (i, 0)),   # anchor rows
                pl.BlockSpec((t_c, 1), lambda i, j: (j, 0)),   # |c|^2/2 (sublane)
                pl.BlockSpec((1, t_a), lambda i, j: (0, i)),   # |a|^2/2 (lane-dense)
                pl.BlockSpec((t_c, 1), lambda i, j: (j, 0)),   # candidate labels
                pl.BlockSpec((1, t_a), lambda i, j: (0, i)),   # anchor labels
            ],
            out_specs=pl.BlockSpec((1, t_a), lambda i, j: (0, i)),
            scratch_shapes=[pltpu.VMEM((1, t_a), jnp.float32),
                            pltpu.VMEM((1, t_a), jnp.float32)],
        ),
        compiler_params=pltpu.CompilerParams(
            dimension_semantics=("parallel", "arbitrary")),
        cost_estimate=cost,
    )(emb_p, emb_p, sq_cand, sq_anch, lab_cand, lab_anch)

    # Tiny O(N) reduction outside the kernel; padded anchors are excluded.
    return jnp.sum(per_anchor[0, :n]) / n


def _reference_loss(embeddings, labels, margin=1.0):
    # Pure-JAX reference mirroring the PyTorch module (default flags).
    emb = embeddings.astype(jnp.float32)
    sq = jnp.sum(emb * emb, axis=1)
    dist = jnp.sqrt(
        jnp.maximum(sq[:, None] + sq[None, :] - 2.0 * (emb @ emb.T), 0.0))
    same = labels[:, None] == labels[None, :]
    hardest_pos = jnp.max(jnp.where(same, dist, -jnp.inf), axis=1)
    hardest_neg = jnp.min(jnp.where(same, jnp.inf, dist), axis=1)
    per_anchor = jnp.maximum(hardest_pos - hardest_neg + margin, 0.0)
    return jnp.mean(per_anchor)


if __name__ == "__main__":
    key = jax.random.PRNGKey(0)
    k1, k2, k3 = jax.random.split(key, 3)

    # Test 1: tiny single-block resident case (N=8, D=32, 4 classes).
    N1, D1 = 8, 32
    emb1 = jax.random.normal(k1, (N1, D1), dtype=jnp.float32)
    lab1 = jnp.array([0, 0, 1, 1, 2, 2, 3, 3], dtype=jnp.int32)
    loss1 = jax.block_until_ready(batch_hard_triplet_loss(emb1, lab1, margin=1.0))
    ref1 = _reference_loss(emb1, lab1, margin=1.0)
    assert jnp.allclose(loss1, ref1, rtol=1e-5, atol=1e-5), (loss1, ref1)

    # Test 2: multi-row-block resident path + padding (N=200 -> 256, grid (2, 1)).
    N2, D2 = 200, 16
    emb2 = jax.random.normal(k2, (N2, D2), dtype=jnp.float32)
    lab2 = jnp.arange(N2, dtype=jnp.int32) % 5
    loss2 = jax.block_until_ready(batch_hard_triplet_loss(emb2, lab2, margin=1.0))
    ref2 = _reference_loss(emb2, lab2, margin=1.0)
    assert jnp.allclose(loss2, ref2, rtol=1e-4, atol=1e-4), (loss2, ref2)

    # Test 3: force the streamed fallback (tiny VMEM budget) -> grid (3, 3);
    # exercises the running max/min carry across the column axis + padding.
    N3, D3 = 300, 24
    emb3 = jax.random.normal(k3, (N3, D3), dtype=jnp.float32)
    lab3 = jnp.arange(N3, dtype=jnp.int32) % 7
    loss3 = jax.block_until_ready(
        batch_hard_triplet_loss(emb3, lab3, margin=1.0, vmem_budget=1 << 20))
    ref3 = _reference_loss(emb3, lab3, margin=1.0)
    assert jnp.allclose(loss3, ref3, rtol=1e-4, atol=1e-4), (loss3, ref3)

    print("KERNEL_OK")
</pallas_src>

<mosaic_0001>
module attributes {stable_mosaic.version = 11 : i64} {
  func.func @_batch_hard_kernel(%arg0: i32, %arg1: i32, %arg2: memref<8x32xf32, #tpu.memory_space<vmem>>, %arg3: memref<8x32xf32, #tpu.memory_space<vmem>>, %arg4: memref<8x1xf32, #tpu.memory_space<vmem>>, %arg5: memref<1x8xf32, #tpu.memory_space<vmem>>, %arg6: memref<8x1xi32, #tpu.memory_space<vmem>>, %arg7: memref<1x8xi32, #tpu.memory_space<vmem>>, %arg8: memref<1x8xf32, #tpu.memory_space<vmem>>, %arg9: memref<1x8xf32, #tpu.memory_space<vmem>>, %arg10: memref<1x8xf32, #tpu.memory_space<vmem>>) attributes {dimension_semantics = [#tpu.dimension_semantics<parallel>, #tpu.dimension_semantics<arbitrary>], iteration_bounds = array<i64: 1, 1>, scalar_prefetch = 0 : i64, scratch_operands = 2 : i64, tpu.core_type = #tpu.core_type<tc>, window_params = [{transform_indices = @transform_0, window_bounds = array<i64: 8, 32>}, {transform_indices = @transform_1, window_bounds = array<i64: 8, 32>}, {transform_indices = @transform_2, window_bounds = array<i64: 8, 1>}, {transform_indices = @transform_3, window_bounds = array<i64: 1, 8>}, {transform_indices = @transform_4, window_bounds = array<i64: 8, 1>}, {transform_indices = @transform_5, window_bounds = array<i64: 1, 8>}, {transform_indices = @transform_6, window_bounds = array<i64: 1, 8>}]} {
    %c0_i32 = arith.constant 0 : i32
    %0 = arith.cmpi eq, %arg1, %c0_i32 : i32
    %1 = arith.extui %0 : i1 to i32
    %c0_i32_0 = arith.constant 0 : i32
    %2 = arith.cmpi ne, %1, %c0_i32_0 : i32
    scf.if %2 {
      %cst_27 = arith.constant 0.000000e+00 : f32
      %36 = vector.broadcast %cst_27 : f32 to vector<1x8xf32>
      %c0_28 = arith.constant 0 : index
      %c0_29 = arith.constant 0 : index
      %37 = vector.load %arg9[%c0_28, %c0_29] : memref<1x8xf32, #tpu.memory_space<vmem>>, vector<1x8xf32>
      tpu.vector_store %arg9[%c0_28, %c0_29], %36 {strides = array<i32>} : memref<1x8xf32, #tpu.memory_space<vmem>>, vector<1x8xf32>,
      %cst_30 = arith.constant 0x7F800000 : f32
      %38 = vector.broadcast %cst_30 : f32 to vector<1x8xf32>
      %c0_31 = arith.constant 0 : index
      %c0_32 = arith.constant 0 : index
      %39 = vector.load %arg10[%c0_31, %c0_32] : memref<1x8xf32, #tpu.memory_space<vmem>>, vector<1x8xf32>
      tpu.vector_store %arg10[%c0_31, %c0_32], %38 {strides = array<i32>} : memref<1x8xf32, #tpu.memory_space<vmem>>, vector<1x8xf32>,
    } else {
    }
    %c0 = arith.constant 0 : index
    %c0_1 = arith.constant 0 : index
    %3 = vector.load %arg2[%c0, %c0_1] : memref<8x32xf32, #tpu.memory_space<vmem>>, vector<8x32xf32>
    %c0_2 = arith.constant 0 : index
    %c0_3 = arith.constant 0 : index
    %4 = vector.load %arg3[%c0_2, %c0_3] : memref<8x32xf32, #tpu.memory_space<vmem>>, vector<8x32xf32>
    %cst = arith.constant dense<0.000000e+00> : vector<8x8xf32>
    %5 = tpu.matmul %3, %4, %cst {dimension_numbers = #tpu.dot_dimension_numbers<[1], [1], [0], [0], [0, 0, 1, 0], [], []>} : vector<8x32xf32>, vector<8x32xf32>, vector<8x8xf32> -> vector<8x8xf32>
    %c0_4 = arith.constant 0 : index
    %c0_5 = arith.constant 0 : index
    %6 = vector.load %arg4[%c0_4, %c0_5] : memref<8x1xf32, #tpu.memory_space<vmem>>, vector<8x1xf32>
    %c0_6 = arith.constant 0 : index
    %c0_7 = arith.constant 0 : index
    %7 = vector.load %arg5[%c0_6, %c0_7] : memref<1x8xf32, #tpu.memory_space<vmem>>, vector<1x8xf32>
    %8 = vector.broadcast %6 : vector<8x1xf32> to vector<8x8xf32>
    %9 = vector.broadcast %7 : vector<1x8xf32> to vector<8x8xf32>
    %10 = arith.addf %8, %9 : vector<8x8xf32>
    %11 = arith.subf %10, %5 : vector<8x8xf32>
    %cst_8 = arith.constant 0.000000e+00 : f32
    %12 = vector.broadcast %cst_8 : f32 to vector<8x8xf32>
    %13 = arith.maximumf %11, %12 : vector<8x8xf32>
    %c0_9 = arith.constant 0 : index
    %c0_10 = arith.constant 0 : index
    %14 = vector.load %arg6[%c0_9, %c0_10] : memref<8x1xi32, #tpu.memory_space<vmem>>, vector<8x1xi32>
    %c0_11 = arith.constant 0 : index
    %c0_12 = arith.constant 0 : index
    %15 = vector.load %arg7[%c0_11, %c0_12] : memref<1x8xi32, #tpu.memory_space<vmem>>, vector<1x8xi32>
    %16 = vector.broadcast %14 : vector<8x1xi32> to vector<8x8xi32>
    %17 = vector.broadcast %15 : vector<1x8xi32> to vector<8x8xi32>
    %18 = arith.cmpi eq, %16, %17 : vector<8x8xi32>
    %cst_13 = arith.constant 0.000000e+00 : f32
    %19 = vector.broadcast %cst_13 : f32 to vector<8x8xf32>
    %20 = arith.select %18, %13, %19 : vector<8x8xi1>, vector<8x8xf32>
    %cst_14 = arith.constant 0x7F800000 : f32
    %21 = vector.broadcast %cst_14 : f32 to vector<8x8xf32>
    %22 = arith.select %18, %21, %13 : vector<8x8xi1>, vector<8x8xf32>
    %c0_15 = arith.constant 0 : index
    %c0_16 = arith.constant 0 : index
    %23 = vector.load %arg9[%c0_15, %c0_16] : memref<1x8xf32, #tpu.memory_space<vmem>>, vector<1x8xf32>
    %cst_17 = arith.constant dense<0xFF800000> : vector<8xf32>
    %24 = vector.multi_reduction <maximumf>, %20, %cst_17 [0] : vector<8x8xf32> to vector<8xf32>
    %25 = vector.shape_cast %24 : vector<8xf32> to vector<1x8xf32>
    %26 = arith.maximumf %23, %25 : vector<1x8xf32>
    %c0_18 = arith.constant 0 : index
    %c0_19 = arith.constant 0 : index
    %27 = vector.load %arg9[%c0_18, %c0_19] : memref<1x8xf32, #tpu.memory_space<vmem>>, vector<1x8xf32>
    tpu.vector_store %arg9[%c0_18, %c0_19], %26 {strides = array<i32>} : memref<1x8xf32, #tpu.memory_space<vmem>>, vector<1x8xf32>,
    %c0_20 = arith.constant 0 : index
    %c0_21 = arith.constant 0 : index
    %28 = vector.load %arg10[%c0_20, %c0_21] : memref<1x8xf32, #tpu.memory_space<vmem>>, vector<1x8xf32>
    %cst_22 = arith.constant dense<0x7F800000> : vector<8xf32>
    %29 = vector.multi_reduction <minimumf>, %22, %cst_22 [0] : vector<8x8xf32> to vector<8xf32>
    %30 = vector.shape_cast %29 : vector<8xf32> to vector<1x8xf32>
    %31 = arith.minimumf %28, %30 : vector<1x8xf32>
    %c0_23 = arith.constant 0 : index
    %c0_24 = arith.constant 0 : index
    %32 = vector.load %arg10[%c0_23, %c0_24] : memref<1x8xf32, #tpu.memory_space<vmem>>, vector<1x8xf32>
    tpu.vector_store %arg10[%c0_23, %c0_24], %31 {strides = array<i32>} : memref<1x8xf32, #tpu.memory_space<vmem>>, vector<1x8xf32>,
    %c0_i32_25 = arith.constant 0 : i32
    %33 = arith.cmpi eq, %arg1, %c0_i32_25 : i32
    %34 = arith.extui %33 : i1 to i32
    %c0_i32_26 = arith.constant 0 : i32
    %35 = arith.cmpi ne, %34, %c0_i32_26 : i32
    scf.if %35 {
      %c0_27 = arith.constant 0 : index
      %c0_28 = arith.constant 0 : index
      %36 = vector.load %arg9[%c0_27, %c0_28] : memref<1x8xf32, #tpu.memory_space<vmem>>, vector<1x8xf32>
      %cst_29 = arith.constant 2.000000e+00 : f32
      %37 = vector.broadcast %cst_29 : f32 to vector<1x8xf32>
      %38 = arith.mulf %37, %36 : vector<1x8xf32>
      %39 = math.sqrt %38 : vector<1x8xf32>
      %c0_30 = arith.constant 0 : index
      %c0_31 = arith.constant 0 : index
      %40 = vector.load %arg10[%c0_30, %c0_31] : memref<1x8xf32, #tpu.memory_space<vmem>>, vector<1x8xf32>
      %cst_32 = arith.constant 2.000000e+00 : f32
      %41 = vector.broadcast %cst_32 : f32 to vector<1x8xf32>
      %42 = arith.mulf %41, %40 : vector<1x8xf32>
      %43 = math.sqrt %42 : vector<1x8xf32>
      %44 = arith.subf %39, %43 : vector<1x8xf32>
      %cst_33 = arith.constant 1.000000e+00 : f32
      %45 = vector.broadcast %cst_33 : f32 to vector<1x8xf32>
      %46 = arith.addf %44, %45 : vector<1x8xf32>
      %cst_34 = arith.constant 0.000000e+00 : f32
      %47 = vector.broadcast %cst_34 : f32 to vector<1x8xf32>
      %48 = arith.maximumf %46, %47 : vector<1x8xf32>
      %c0_35 = arith.constant 0 : index
      %c0_36 = arith.constant 0 : index
      %49 = vector.load %arg8[%c0_35, %c0_36] : memref<1x8xf32, #tpu.memory_space<vmem>>, vector<1x8xf32>
      tpu.vector_store %arg8[%c0_35, %c0_36], %48 {strides = array<i32>} : memref<1x8xf32, #tpu.memory_space<vmem>>, vector<1x8xf32>,
    } else {
    }
    return
  }
  func.func @transform_0(%arg0: i32, %arg1: i32) -> (i32, i32) {
    %c0_i32 = arith.constant 0 : i32
    %c0_i32_0 = arith.constant 0 : i32
    return %arg1, %c0_i32 : i32, i32
  }
  func.func @transform_1(%arg0: i32, %arg1: i32) -> (i32, i32) {
    %c0_i32 = arith.constant 0 : i32
    %c0_i32_0 = arith.constant 0 : i32
    return %arg0, %c0_i32 : i32, i32
  }
  func.func @transform_2(%arg0: i32, %arg1: i32) -> (i32, i32) {
    %c0_i32 = arith.constant 0 : i32
    %c0_i32_0 = arith.constant 0 : i32
    return %arg1, %c0_i32 : i32, i32
  }
  func.func @transform_3(%arg0: i32, %arg1: i32) -> (i32, i32) {
    %c0_i32 = arith.constant 0 : i32
    %c0_i32_0 = arith.constant 0 : i32
    return %c0_i32, %arg0 : i32, i32
  }
  func.func @transform_4(%arg0: i32, %arg1: i32) -> (i32, i32) {
    %c0_i32 = arith.constant 0 : i32
    %c0_i32_0 = arith.constant 0 : i32
    return %arg1, %c0_i32 : i32, i32
  }
  func.func @transform_5(%arg0: i32, %arg1: i32) -> (i32, i32) {
    %c0_i32 = arith.constant 0 : i32
    %c0_i32_0 = arith.constant 0 : i32
    return %c0_i32, %arg0 : i32, i32
  }
  func.func @transform_6(%arg0: i32, %arg1: i32) -> (i32, i32) {
    %c0_i32 = arith.constant 0 : i32
    %c0_i32_0 = arith.constant 0 : i32
    return %c0_i32, %arg0 : i32, i32
  }
}

</mosaic_0001>

<bundles_post_ra>
// kernel: tpu_custom_call.1
= control target key start
LH: loop header
LB: loop body
LE: loop exit
PB: predicated region body
PF: predicated region fallthrough
CT: control target
= control target key end

     0   :  { %vm28_vm0 = vcmask 57344   ;;  %vm33_vm1 = vcmask 261120   ;;  %v242_v1 = vmov 0.0   ;;  %v243_v2 = vmov inf   ;;  %s308_s0 = inlined_call_operand.vmem [shape: f32[8,32], index: 0, kind: input, shape index: {}]   ;;  %s309_s1 = inlined_call_operand.vmem [shape: f32[8,32], index: 1, kind: input, shape index: {}]   ;;  %s310_s2 = inlined_call_operand.vmem [shape: f32[8,1], index: 2, kind: input, shape index: {}]   ;;  %s311_s3 = inlined_call_operand.vmem [shape: f32[1,8], index: 3, kind: input, shape index: {}]   ;;  %s312_s4 = inlined_call_operand.vmem [shape: s32[8,1], index: 4, kind: input, shape index: {}]   ;;  %s313_s5 = inlined_call_operand.vmem [shape: s32[1,8], index: 5, kind: input, shape index: {}]   ;;  %s314_s6 = inlined_call_operand.hbm [shape: f32[1,8], index: 6, kind: output, shape index: {}]  }
   0x1   :  { %v32_v0 = vld [vmem:[%s309_s1] sm:$0xff]  ;;  %29 = vst.msk [vmem:[#allocation2] sm:$0x1] %vm28_vm0, %v242_v1  ;;  %30 = vst.msk [vmem:[#allocation3] sm:$0x1] %vm28_vm0, %v243_v2  ;;  %205 = vmatprep.subr.mxu0 %v242_v1  ;;  %vm244_vm2 = vmmov 0  }
   0x2   :  { %v110_v3 = vld [vmem:[%s310_s2] sm:$0xff]  ;;  %206 = vmatpush3.xpose.msk.msra.mxu0 %vm33_vm1, %v32_v0  ;;  %207 = vmatprep.mubr.msk.f32.mxu0 %vm244_vm2, %v242_v1 }
   0x3   :  { %v31_v4 = vld [vmem:[%s308_s0] sm:$0xff] }
   0x4   :  { %11 = vsyncpa [#allocation5], 0  ;;  %v245_v5 = vmov 0   ;;  %v126_v6 = vld [vmem:[%s312_s4] sm:$0xff]  ;;  %vm139_vm3 = vcmask 64512   ;;  %s246_s0 = smov [#allocation4]  }
   0x5   :  { %215 = vset.pattern.permute.xlu0 %v245_v5  ;;  %208 = vmatmul.mubr.msk.f32.vlgmr.msra.gmra.mxu0 %vm33_vm1, %v31_v4  ;;  %v201_v7 = vld [vmem:[%s311_s3] ss:$0 sm:$0xff]  ;;  %s191_s3 = sshll.u32 %s246_s0, 4  ;;  %s192_s3 = int_to_ptr.vmem [resolvable:$true] %s191_s3 }
   0x6   :  { %114 = vperm.xlu0 %215, %v110_v3   ;;  %v202_v11 = vld [vmem:[%s313_s5] ss:$0 sm:$0xff]  ;;  %s220_s4 = scalar_lea.vmem %s192_s3, 16  ;;  %s224_s5 = scalar_lea.vmem %s192_s3, 32 }
   0x7   :  { %p221_p0 = scmp.ne.s32.totalorder %s192_s3, %s220_s4  ;;  %p225_p1 = scmp.lt.s32.totalorder %s192_s3, %s192_s3 }
   0x8   :  { %v138_v30 = vld [vmem:[#allocation2] sm:$0x1]  ;;  %v150_v31 = vld [vmem:[#allocation3] sm:$0x1]  ;;  %p226_p2 = scmp.lt.s32.totalorder %s224_s5, %s220_s4 }
   0xa   :  { %129 = vperm.xlu0 %215, %v126_v6   ;;  %p227_p3 = por %p226_p2, %p225_p1 }
   0xc   :  { %p228_p4 = pnand %p227_p3, %p221_p0 }
  0x81   :  { %v115_v8 = vpop.permute.xlu0 %114 }
  0x82   :  { %v123_v9 = vadd.f32 %v201_v7, %v115_v8 }
  0x85   :  { %v130_v12 = vpop.permute.xlu0 %129 }
  0x86   :  { %vm135_vm4 = vcmp.eq.s32.totalorder %v130_v12, %v202_v11 }
  0xc5   :  { %v106_v10 = vpop.f32.mrf.mxu0 }
  0xc6   :  { %v124_v13 = vsub.f32 %v123_v9, %v106_v10 }
  0xc7   :  { %v209_v14 = vpop.f32.mrf.mxu0 }
  0xc8   :  { %v125_v15 = vmax.f32 %v124_v13, 0.0 }
  0xca   :  { %v136_v16 = vsel %vm135_vm4, %v125_v15, 0.0  ;;  %v137_v17 = vsel %vm135_vm4, inf, %v125_v15 }
  0xcb   :  { %v140_v18 = vsel %vm139_vm3, %v136_v16, -inf  ;;  %v151_v19 = vsel %vm139_vm3, %v137_v17, inf }
  0xcc   :  { %v141_v20 = vrot.slane %v140_v18, 4  ;;  %v152_v21 = vrot.slane %v151_v19, 4 }
  0xce   :  { %v142_v22 = vmax.f32 %v140_v18, %v141_v20  ;;  %v153_v23 = vmin.f32 %v151_v19, %v152_v21 }
  0xd0   :  { %v143_v24 = vrot.slane %v142_v22, 2  ;;  %v154_v25 = vrot.slane %v153_v23, 2 }
  0xd2   :  { %v144_v26 = vmax.f32 %v142_v22, %v143_v24  ;;  %v155_v27 = vmin.f32 %v153_v23, %v154_v25 }
  0xd4   :  { %v145_v28 = vrot.slane %v144_v26, 1  ;;  %v156_v29 = vrot.slane %v155_v27, 1 }
  0xd6   :  { %v146_v32 = vmax.f32 %v144_v26, %v145_v28  ;;  %v157_v33 = vmin.f32 %v155_v27, %v156_v29 }
  0xd8   :  { %v147_v34 = vmax.f32 %v138_v30, %v146_v32  ;;  %v158_v35 = vmin.f32 %v150_v31, %v157_v33 }
  0xda   :  { %149 = vst.msk [vmem:[#allocation2] sm:$0x1] %vm28_vm0, %v147_v34  ;;  %159 = vst.msk [vmem:[#allocation3] sm:$0x1] %vm28_vm0, %v158_v35 }
  0xe1   :  { %v163_v36 = vld [vmem:[#allocation2] sm:$0x1]  ;;  %v172_v37 = vld [vmem:[#allocation3] sm:$0x1] }
  0xe2   :  { %v164_v38 = vmul.f32 2.0, %v163_v36  ;;  %v173_v39 = vmul.f32 2.0, %v172_v37 }
  0xe4   :  { %216 = vrsqrt.f32 %v164_v38  ;;  %vm167_vm5 = vcmp.eq.f32.partialorder %v164_v38, inf  ;;  %v170_v43 = vand.u32 2147483648, %v164_v38  ;;  %vm169_vm6 = vcmp.eq.f32.partialorder %v164_v38, 0.0 }
  0xe5   :  { %218 = vrsqrt.f32 %v173_v39  ;;  %vm176_vm7 = vcmp.eq.f32.partialorder %v173_v39, inf  ;;  %v179_v46 = vand.u32 2147483648, %v173_v39  ;;  %vm178_vm8 = vcmp.eq.f32.partialorder %v173_v39, 0.0 }
  0xf1   :  { %v217_v40 = vpop.eup %216 }
  0xf2   :  { %v219_v41 = vpop.eup %218  ;;  %v166_v42 = vmul.f32 %v217_v40, %v164_v38 }
  0xf3   :  { %v175_v44 = vmul.f32 %v219_v41, %v173_v39 }
  0xf4   :  { %v168_v45 = vsel %vm167_vm5, %v164_v38, %v166_v42 }
  0xf5   :  { %v171_v47 = vsel %vm169_vm6, %v170_v43, %v168_v45  ;;  %v177_v48 = vsel %vm176_vm7, %v173_v39, %v175_v44 }
  0xf6   :  { %v180_v49 = vsel %vm178_vm8, %v179_v46, %v177_v48 }
  0xf7   :  { %v181_v50 = vsub.f32 %v171_v47, %v180_v49 }
  0xf9   :  { %v182_v51 = vadd.f32 1.0, %v181_v50 }
  0xfb   :  { %v183_v52 = vmax.f32 %v182_v51, 0.0 }
  0xfd   :  { %184 = vst.msk [vmem:[#allocation4] sm:$0x1] %vm28_vm0, %v183_v52 }
  0xfe   :  { %231 = shalt.err (!%p228_p4)
}
  0xff   :  { %194 = dma.vmem_to_hbm [thread:$0]  %s192_s3, 16, %s314_s6, [#allocation5]  }
 0x100   :  { %240 = dma.done.wait [#allocation5], 16  }
 0x101   :  { %241 = vsyncadd [#allocation5], 4294967280 }
 0x102   :  { %198 = vsyncpa [#allocation5], 1 }

</bundles_post_ra>
